<compile_context>
chip_gen: v5e
topology: v5e:2x2
jax: 0.10.0
libtpu: 0.0.40
codegen_flags: <defaults>
</compile_context>

<pallas_src>
import functools

import jax
import jax.numpy as jnp
from jax import lax
from jax.experimental import pallas as pl
from jax.experimental.pallas import tpu as pltpu


# ----------------------------- helpers ---------------------------------------

def _layernorm(v, w, b, eps):
    mu = jnp.mean(v, axis=-1, keepdims=True)
    var = jnp.mean((v - mu) ** 2, axis=-1, keepdims=True)
    return (v - mu) * lax.rsqrt(var + eps) * w + b


def _pick_tile(n, max_t):
    """Largest tile <= max_t that divides n (full extent if small)."""
    if n <= max_t:
        return n
    for t in (max_t, 512, 256, 128, 64, 32, 16, 8):
        if t <= max_t and n % t == 0:
            return t
    return n


def _padded_bytes(shape, dtype):
    """Rough VMEM footprint of one block, padded to (8, 128) tiles."""
    dims = (1, 1) + tuple(int(d) for d in shape)
    lead = 1
    for d in dims[:-2]:
        lead *= d
    sub = -(-dims[-2] // 8) * 8
    lane = -(-dims[-1] // 128) * 128
    return lead * sub * lane * jnp.dtype(dtype).itemsize


def _vmem_limit_bytes(block_specs, scratch_specs=()):
    """Scoped-VMEM request sized to the resident set (double-buffered blocks)."""
    total = 2 * sum(_padded_bytes(s, d) for s, d in block_specs)
    total += sum(_padded_bytes(s, d) for s, d in scratch_specs)
    total += 4 << 20                                   # compiler scratch slack
    return int(min(max(total, 32 << 20), 64 << 20))    # clamp: all generations


# ----------------------------- kernel A: LN1 + QKV ----------------------------

def qkv_kernel(x_ref, ln1w_ref, ln1b_ref, wq_ref, wk_ref, wv_ref,
               q_ref, k_ref, v_ref, *, heads, eps):
    cdt = wq_ref.dtype                                     # bf16 compute dtype
    xn = _layernorm(x_ref[0], ln1w_ref[...], ln1b_ref[...], eps).astype(cdt)
    # Per-head matmuls against static ref slices of the head-major weights:
    # K = D full contraction fill, results land directly in (B, H, N, dh).
    for h in range(heads):
        q_ref[0, h] = jnp.dot(xn, wq_ref[h],               # Wq pre-scaled
                              preferred_element_type=jnp.float32).astype(cdt)
        k_ref[0, h] = jnp.dot(xn, wk_ref[h],
                              preferred_element_type=jnp.float32).astype(cdt)
        v_ref[0, h] = jnp.dot(xn, wv_ref[h],
                              preferred_element_type=jnp.float32).astype(cdt)


def qkv_projection(x, p, *, heads, dim_head, eps, max_ts=256):
    B, N, D = x.shape
    ts = _pick_tile(N, max_ts)
    n_s = N // ts
    cdt = p["wq_h"].dtype

    in_blocks = [((1, ts, D), x.dtype), ((1, D), jnp.float32), ((1, D), jnp.float32)] \
              + [((heads, D, dim_head), cdt)] * 3
    out_blocks = [((1, heads, ts, dim_head), cdt)] * 3
    vmem_limit = _vmem_limit_bytes(in_blocks + out_blocks)

    out_sds = jax.ShapeDtypeStruct((B, heads, N, dim_head), cdt)
    wspec = pl.BlockSpec((heads, D, dim_head), lambda b, s: (0, 0, 0))

    return pl.pallas_call(
        functools.partial(qkv_kernel, heads=heads, eps=eps),
        out_shape=(out_sds, out_sds, out_sds),
        grid_spec=pltpu.PrefetchScalarGridSpec(
            num_scalar_prefetch=0,
            grid=(B, n_s),
            in_specs=[
                pl.BlockSpec((1, ts, D), lambda b, s: (b, s, 0)),   # x tile
                pl.BlockSpec((1, D), lambda b, s: (0, 0)),          # ln1 w
                pl.BlockSpec((1, D), lambda b, s: (0, 0)),          # ln1 b
                wspec, wspec, wspec,                                # Wq, Wk, Wv
            ],
            out_specs=[pl.BlockSpec((1, heads, ts, dim_head),
                                    lambda b, s: (b, 0, s, 0))] * 3,
        ),
        compiler_params=pltpu.CompilerParams(
            dimension_semantics=("parallel", "parallel"),
            vmem_limit_bytes=vmem_limit),
    )(x, p["ln1_w"], p["ln1_b"], p["wq_h"], p["wk_h"], p["wv_h"])


# ------------------ kernel B: flash attention + out-proj + MLP ----------------

def attn_mlp_kernel(x_ref, q_ref, k_ref, v_ref,
                    wout_ref, bout_ref, ln2w_ref, ln2b_ref,
                    w1_ref, b1_ref, w2_ref, b2_ref,
                    o_ref,
                    m_scr, l_scr, acc_scr,
                    *, heads, eps):
    ki = pl.program_id(2)
    cdt = q_ref.dtype

    @pl.when(ki == 0)
    def _():
        m_scr[...] = jnp.full_like(m_scr, -jnp.inf)
        l_scr[...] = jnp.zeros_like(l_scr)
        acc_scr[...] = jnp.zeros_like(acc_scr)

    q = q_ref[0]                                 # (H, TQ,  dh) bf16, pre-scaled
    k = k_ref[0]                                 # (H, TKV, dh) bf16
    v = v_ref[0]                                 # (H, TKV, dh) bf16

    # online softmax over the KV grid axis
    s = jnp.einsum('hqd,hkd->hqk', q, k,
                   preferred_element_type=jnp.float32)         # (H, TQ, TKV)
    m_prev = m_scr[...]
    m_new = jnp.maximum(m_prev, jnp.max(s, axis=-1, keepdims=True))
    alpha = jnp.exp(m_prev - m_new)
    p = jnp.exp(s - m_new)
    l_scr[...] = alpha * l_scr[...] + jnp.sum(p, axis=-1, keepdims=True)
    acc_scr[...] = alpha * acc_scr[...] + jnp.einsum(
        'hqk,hkd->hqd', p.astype(cdt), v, preferred_element_type=jnp.float32)
    m_scr[...] = m_new

    @pl.when(ki == pl.num_programs(2) - 1)
    def _():
        inv_l = pl.reciprocal(l_scr[...], approx=True)          # EUP slot
        attn = acc_scr[...] * inv_l                             # (H, TQ, dh) f32
        # gather heads into one lane-dense (TQ, inner) operand, then a single
        # full-K output projection
        attn_cat = jnp.concatenate([attn[h] for h in range(heads)], axis=-1)
        out = jnp.dot(attn_cat.astype(cdt), wout_ref[...],
                      preferred_element_type=jnp.float32) + bout_ref[...]
        x1 = x_ref[0] + out                                     # residual

        xn2 = _layernorm(x1, ln2w_ref[...], ln2b_ref[...], eps)
        hdn = jnp.dot(xn2.astype(cdt), w1_ref[...],
                      preferred_element_type=jnp.float32) + b1_ref[...]
        hdn = jax.nn.gelu(hdn, approximate=False)   # PyTorch nn.GELU default (erf)
        ff = jnp.dot(hdn.astype(cdt), w2_ref[...],
                     preferred_element_type=jnp.float32) + b2_ref[...]
        o_ref[0] = x1 + ff                                      # residual


def attention_mlp(x, q, k, v, p, *, heads, dim_head, eps,
                  max_tq=256, max_tkv=512):
    B, N, D = x.shape
    inner = heads * dim_head
    mlp = p["w1_t"].shape[1]
    cdt = q.dtype

    tq = _pick_tile(N, max_tq)
    tkv = _pick_tile(N, max_tkv)
    n_q, n_kv = N // tq, N // tkv

    const = lambda shape: pl.BlockSpec(shape, lambda b, qi, ki: (0,) * len(shape))

    in_blocks = [((1, tq, D), x.dtype),
                 ((1, heads, tq, dim_head), cdt),
                 ((1, heads, tkv, dim_head), cdt),
                 ((1, heads, tkv, dim_head), cdt),
                 ((inner, D), cdt), ((1, D), jnp.float32),
                 ((1, D), jnp.float32), ((1, D), jnp.float32),
                 ((D, mlp), cdt), ((1, mlp), jnp.float32),
                 ((mlp, D), cdt), ((1, D), jnp.float32)]
    out_blocks = [((1, tq, D), x.dtype)]
    scratch_blocks = [((heads, tq, 1), jnp.float32),
                      ((heads, tq, 1), jnp.float32),
                      ((heads, tq, dim_head), jnp.float32)]
    vmem_limit = _vmem_limit_bytes(in_blocks + out_blocks, scratch_blocks)

    return pl.pallas_call(
        functools.partial(attn_mlp_kernel, heads=heads, eps=eps),
        out_shape=jax.ShapeDtypeStruct((B, N, D), x.dtype),
        grid_spec=pltpu.PrefetchScalarGridSpec(
            num_scalar_prefetch=0,
            grid=(B, n_q, n_kv),
            in_specs=[
                pl.BlockSpec((1, tq, D), lambda b, qi, ki: (b, qi, 0)),     # x tile
                pl.BlockSpec((1, heads, tq, dim_head),
                             lambda b, qi, ki: (b, 0, qi, 0)),              # Q tile
                pl.BlockSpec((1, heads, tkv, dim_head),
                             lambda b, qi, ki: (b, 0, ki, 0)),              # K tile
                pl.BlockSpec((1, heads, tkv, dim_head),
                             lambda b, qi, ki: (b, 0, ki, 0)),              # V tile
                const((inner, D)), const((1, D)),                           # Wout, b_out
                const((1, D)), const((1, D)),                               # ln2 w, b
                const((D, mlp)), const((1, mlp)),                           # W1, b1
                const((mlp, D)), const((1, D)),                             # W2, b2
            ],
            out_specs=pl.BlockSpec((1, tq, D), lambda b, qi, ki: (b, qi, 0)),
            scratch_shapes=[
                pltpu.VMEM((heads, tq, 1), jnp.float32),         # m (running max)
                pltpu.VMEM((heads, tq, 1), jnp.float32),         # l (running sum)
                pltpu.VMEM((heads, tq, dim_head), jnp.float32),  # acc
            ],
        ),
        compiler_params=pltpu.CompilerParams(
            dimension_semantics=("parallel", "parallel", "arbitrary"),
            vmem_limit_bytes=vmem_limit),
    )(x, q, k, v,
      p["wout_t"], p["b_out"], p["ln2_w"], p["ln2_b"],
      p["w1_t"], p["b1"], p["w2_t"], p["b2"])


# ----------------------------- layer / forward --------------------------------

def transformer_layer(x, packed, *, heads, dim_head, eps=1e-5):
    q, k, v = qkv_projection(x, packed, heads=heads, dim_head=dim_head, eps=eps)
    return attention_mlp(x, q, k, v, packed, heads=heads, dim_head=dim_head, eps=eps)


def transformer_forward(x, packed_layers, *, heads, dim_head):
    # TODO(synk): bf16 inter-layer activations would halve x DMA / writeback.
    for packed in packed_layers:
        x = transformer_layer(x, packed, heads=heads, dim_head=dim_head)
    return x


# ----------------------------- parameter packing -------------------------------

def pack_layer_params(p, *, heads, dim_head, compute_dtype=jnp.bfloat16):
    """One-time: bf16 conversion, head-major weight layout, scale folded into Wq."""
    D = p["wqkv_t"].shape[0]
    inner = heads * dim_head
    scale = dim_head ** (-0.5)
    wq = p["wqkv_t"][:, :inner]
    wk = p["wqkv_t"][:, inner:2 * inner]
    wv = p["wqkv_t"][:, 2 * inner:]
    to_heads = lambda w: jnp.transpose(w.reshape(D, heads, dim_head), (1, 0, 2))
    return {
        "ln1_w": p["ln1_w"], "ln1_b": p["ln1_b"],
        "wq_h": (to_heads(wq) * scale).astype(compute_dtype),
        "wk_h": to_heads(wk).astype(compute_dtype),
        "wv_h": to_heads(wv).astype(compute_dtype),
        "wout_t": p["wout_t"].astype(compute_dtype), "b_out": p["b_out"],
        "ln2_w": p["ln2_w"], "ln2_b": p["ln2_b"],
        "w1_t": p["w1_t"].astype(compute_dtype), "b1": p["b1"],
        "w2_t": p["w2_t"].astype(compute_dtype), "b2": p["b2"],
    }


# ----------------------------- reference (plain JAX, f32) ----------------------

def reference_forward(x, layer_params, *, heads, dim_head, eps=1e-5):
    inner = heads * dim_head
    scale = dim_head ** (-0.5)

    def layernorm(v, w, b):
        mu = jnp.mean(v, axis=-1, keepdims=True)
        var = jnp.mean((v - mu) ** 2, axis=-1, keepdims=True)
        return (v - mu) / jnp.sqrt(var + eps) * w + b

    for p in layer_params:
        xn = layernorm(x, p["ln1_w"][0], p["ln1_b"][0])
        qkv = xn @ p["wqkv_t"]
        q, k, v = jnp.split(qkv, 3, axis=-1)
        B, N, _ = x.shape

        def split_heads(t):
            return t.reshape(B, N, heads, dim_head).transpose(0, 2, 1, 3)
        q, k, v = map(split_heads, (q, k, v))
        dots = jnp.einsum("bhqd,bhkd->bhqk", q, k) * scale
        attn = jax.nn.softmax(dots, axis=-1)
        out = jnp.einsum("bhqk,bhkd->bhqd", attn, v)
        out = out.transpose(0, 2, 1, 3).reshape(B, N, inner)
        x = x + (out @ p["wout_t"] + p["b_out"][0])

        xn2 = layernorm(x, p["ln2_w"][0], p["ln2_b"][0])
        h = jax.nn.gelu(xn2 @ p["w1_t"] + p["b1"][0], approximate=False)
        x = x + (h @ p["w2_t"] + p["b2"][0])
    return x


# ----------------------------- parameter init ----------------------------------

def init_layer_params(key, dim, heads, dim_head, mlp_dim):
    inner = heads * dim_head
    ks = jax.random.split(key, 4)
    s = 0.02
    return {
        "ln1_w": jnp.ones((1, dim), jnp.float32),
        "ln1_b": jnp.zeros((1, dim), jnp.float32),
        "wqkv_t": s * jax.random.normal(ks[0], (dim, 3 * inner), jnp.float32),
        "wout_t": s * jax.random.normal(ks[1], (inner, dim), jnp.float32),
        "b_out": jnp.zeros((1, dim), jnp.float32),
        "ln2_w": jnp.ones((1, dim), jnp.float32),
        "ln2_b": jnp.zeros((1, dim), jnp.float32),
        "w1_t": s * jax.random.normal(ks[2], (dim, mlp_dim), jnp.float32),
        "b1": jnp.zeros((1, mlp_dim), jnp.float32),
        "w2_t": s * jax.random.normal(ks[3], (mlp_dim, dim), jnp.float32),
        "b2": jnp.zeros((1, dim), jnp.float32),
    }


# ----------------------------- main ---------------------------------------------

if __name__ == "__main__":
    # Small shapes consistent with the module's forward: x is (batch, seq, dim).
    B, N = 2, 8
    dim, depth, heads, dim_head, mlp_dim = 32, 2, 2, 16, 64

    root = jax.random.PRNGKey(0)
    x_key, *layer_keys = jax.random.split(root, depth + 1)
    x = jax.random.normal(x_key, (B, N, dim), jnp.float32)
    layer_params = [init_layer_params(k, dim, heads, dim_head, mlp_dim)
                    for k in layer_keys]
    packed_layers = [pack_layer_params(p, heads=heads, dim_head=dim_head)
                     for p in layer_params]

    out = transformer_forward(x, packed_layers, heads=heads, dim_head=dim_head)
    out = jax.block_until_ready(out)

    ref = reference_forward(x, layer_params, heads=heads, dim_head=dim_head)
    assert out.shape == (B, N, dim)
    max_err = jnp.max(jnp.abs(out - ref))
    # bf16 matmul operands, scale folded into bf16 Wq, and approx reciprocal in
    # softmax -> validate against the f32 reference at 2e-2.
    assert jnp.allclose(out, ref, rtol=2e-2, atol=2e-2), f"max abs err = {max_err}"

    print("KERNEL_OK")
</pallas_src>

<mosaic_0001>
module attributes {stable_mosaic.version = 11 : i64} {
  func.func @qkv_kernel(%arg0: i32, %arg1: i32, %arg2: memref<1x8x32xf32, #tpu.memory_space<vmem>>, %arg3: memref<1x32xf32, #tpu.memory_space<vmem>>, %arg4: memref<1x32xf32, #tpu.memory_space<vmem>>, %arg5: memref<2x32x16xbf16, #tpu.memory_space<vmem>>, %arg6: memref<2x32x16xbf16, #tpu.memory_space<vmem>>, %arg7: memref<2x32x16xbf16, #tpu.memory_space<vmem>>, %arg8: memref<1x2x8x16xbf16, #tpu.memory_space<vmem>>, %arg9: memref<1x2x8x16xbf16, #tpu.memory_space<vmem>>, %arg10: memref<1x2x8x16xbf16, #tpu.memory_space<vmem>>) attributes {dimension_semantics = [#tpu.dimension_semantics<parallel>, #tpu.dimension_semantics<parallel>], iteration_bounds = array<i64: 2, 1>, scalar_prefetch = 0 : i64, scratch_operands = 0 : i64, tpu.core_type = #tpu.core_type<tc>, window_params = [{transform_indices = @transform_0, window_bounds = array<i64: 1, 8, 32>}, {pipeline_mode = #tpu.pipeline_mode<synchronous>, transform_indices = @transform_1, window_bounds = array<i64: 1, 32>}, {pipeline_mode = #tpu.pipeline_mode<synchronous>, transform_indices = @transform_2, window_bounds = array<i64: 1, 32>}, {pipeline_mode = #tpu.pipeline_mode<synchronous>, transform_indices = @transform_3, window_bounds = array<i64: 2, 32, 16>}, {pipeline_mode = #tpu.pipeline_mode<synchronous>, transform_indices = @transform_4, window_bounds = array<i64: 2, 32, 16>}, {pipeline_mode = #tpu.pipeline_mode<synchronous>, transform_indices = @transform_5, window_bounds = array<i64: 2, 32, 16>}, {transform_indices = @transform_6, window_bounds = array<i64: 1, 2, 8, 16>}, {transform_indices = @transform_7, window_bounds = array<i64: 1, 2, 8, 16>}, {transform_indices = @transform_8, window_bounds = array<i64: 1, 2, 8, 16>}]} {
    %c0 = arith.constant 0 : index
    %c0_0 = arith.constant 0 : index
    %c0_1 = arith.constant 0 : index
    %0 = vector.load %arg2[%c0, %c0_0, %c0_1] : memref<1x8x32xf32, #tpu.memory_space<vmem>>, vector<1x8x32xf32>
    %1 = vector.shape_cast %0 : vector<1x8x32xf32> to vector<8x32xf32>
    %c0_2 = arith.constant 0 : index
    %c0_3 = arith.constant 0 : index
    %2 = vector.load %arg3[%c0_2, %c0_3] : memref<1x32xf32, #tpu.memory_space<vmem>>, vector<1x32xf32>
    %c0_4 = arith.constant 0 : index
    %c0_5 = arith.constant 0 : index
    %3 = vector.load %arg4[%c0_4, %c0_5] : memref<1x32xf32, #tpu.memory_space<vmem>>, vector<1x32xf32>
    %cst = arith.constant dense<0.000000e+00> : vector<8xf32>
    %4 = vector.multi_reduction <add>, %1, %cst [1] : vector<8x32xf32> to vector<8xf32>
    %5 = vector.shape_cast %4 : vector<8xf32> to vector<8x1xf32>
    %cst_6 = arith.constant 3.200000e+01 : f32
    %6 = vector.broadcast %cst_6 : f32 to vector<8x1xf32>
    %7 = arith.divf %5, %6 : vector<8x1xf32>
    %8 = vector.broadcast %7 : vector<8x1xf32> to vector<8x32xf32>
    %9 = arith.subf %1, %8 : vector<8x32xf32>
    %10 = arith.mulf %9, %9 : vector<8x32xf32>
    %cst_7 = arith.constant dense<0.000000e+00> : vector<8xf32>
    %11 = vector.multi_reduction <add>, %10, %cst_7 [1] : vector<8x32xf32> to vector<8xf32>
    %12 = vector.shape_cast %11 : vector<8xf32> to vector<8x1xf32>
    %cst_8 = arith.constant 3.200000e+01 : f32
    %13 = vector.broadcast %cst_8 : f32 to vector<8x1xf32>
    %14 = arith.divf %12, %13 : vector<8x1xf32>
    %15 = vector.broadcast %7 : vector<8x1xf32> to vector<8x32xf32>
    %16 = arith.subf %1, %15 : vector<8x32xf32>
    %cst_9 = arith.constant 9.99999974E-6 : f32
    %17 = vector.broadcast %cst_9 : f32 to vector<8x1xf32>
    %18 = arith.addf %14, %17 : vector<8x1xf32>
    %19 = math.rsqrt %18 : vector<8x1xf32>
    %20 = vector.broadcast %19 : vector<8x1xf32> to vector<8x32xf32>
    %21 = arith.mulf %16, %20 : vector<8x32xf32>
    %22 = vector.broadcast %2 : vector<1x32xf32> to vector<8x32xf32>
    %23 = arith.mulf %21, %22 : vector<8x32xf32>
    %24 = vector.broadcast %3 : vector<1x32xf32> to vector<8x32xf32>
    %25 = arith.addf %23, %24 : vector<8x32xf32>
    %26 = arith.truncf %25 : vector<8x32xf32> to vector<8x32xbf16>
    %c0_10 = arith.constant 0 : index
    %c0_11 = arith.constant 0 : index
    %c0_12 = arith.constant 0 : index
    %27 = vector.load %arg5[%c0_10, %c0_11, %c0_12] : memref<2x32x16xbf16, #tpu.memory_space<vmem>>, vector<1x32x16xbf16>
    %28 = vector.shape_cast %27 : vector<1x32x16xbf16> to vector<32x16xbf16>
    %cst_13 = arith.constant dense<0.000000e+00> : vector<8x16xf32>
    %29 = tpu.matmul %26, %28, %cst_13 {dimension_numbers = #tpu.dot_dimension_numbers<[1], [0], [0], [1], [0, 0, 1, 1], [], []>} : vector<8x32xbf16>, vector<32x16xbf16>, vector<8x16xf32> -> vector<8x16xf32>
    %30 = arith.truncf %29 : vector<8x16xf32> to vector<8x16xbf16>
    %c0_14 = arith.constant 0 : index
    %c0_15 = arith.constant 0 : index
    %c0_16 = arith.constant 0 : index
    %c0_17 = arith.constant 0 : index
    %31 = vector.load %arg8[%c0_14, %c0_15, %c0_16, %c0_17] : memref<1x2x8x16xbf16, #tpu.memory_space<vmem>>, vector<1x1x8x16xbf16>
    %32 = vector.shape_cast %31 : vector<1x1x8x16xbf16> to vector<8x16xbf16>
    %33 = vector.shape_cast %30 : vector<8x16xbf16> to vector<1x1x8x16xbf16>
    tpu.vector_store %arg8[%c0_14, %c0_15, %c0_16, %c0_17], %33 {strides = array<i32>} : memref<1x2x8x16xbf16, #tpu.memory_space<vmem>>, vector<1x1x8x16xbf16>,
    %c0_18 = arith.constant 0 : index
    %c0_19 = arith.constant 0 : index
    %c0_20 = arith.constant 0 : index
    %34 = vector.load %arg6[%c0_18, %c0_19, %c0_20] : memref<2x32x16xbf16, #tpu.memory_space<vmem>>, vector<1x32x16xbf16>
    %35 = vector.shape_cast %34 : vector<1x32x16xbf16> to vector<32x16xbf16>
    %cst_21 = arith.constant dense<0.000000e+00> : vector<8x16xf32>
    %36 = tpu.matmul %26, %35, %cst_21 {dimension_numbers = #tpu.dot_dimension_numbers<[1], [0], [0], [1], [0, 0, 1, 1], [], []>} : vector<8x32xbf16>, vector<32x16xbf16>, vector<8x16xf32> -> vector<8x16xf32>
    %37 = arith.truncf %36 : vector<8x16xf32> to vector<8x16xbf16>
    %c0_22 = arith.constant 0 : index
    %c0_23 = arith.constant 0 : index
    %c0_24 = arith.constant 0 : index
    %c0_25 = arith.constant 0 : index
    %38 = vector.load %arg9[%c0_22, %c0_23, %c0_24, %c0_25] : memref<1x2x8x16xbf16, #tpu.memory_space<vmem>>, vector<1x1x8x16xbf16>
    %39 = vector.shape_cast %38 : vector<1x1x8x16xbf16> to vector<8x16xbf16>
    %40 = vector.shape_cast %37 : vector<8x16xbf16> to vector<1x1x8x16xbf16>
    tpu.vector_store %arg9[%c0_22, %c0_23, %c0_24, %c0_25], %40 {strides = array<i32>} : memref<1x2x8x16xbf16, #tpu.memory_space<vmem>>, vector<1x1x8x16xbf16>,
    %c0_26 = arith.constant 0 : index
    %c0_27 = arith.constant 0 : index
    %c0_28 = arith.constant 0 : index
    %41 = vector.load %arg7[%c0_26, %c0_27, %c0_28] : memref<2x32x16xbf16, #tpu.memory_space<vmem>>, vector<1x32x16xbf16>
    %42 = vector.shape_cast %41 : vector<1x32x16xbf16> to vector<32x16xbf16>
    %cst_29 = arith.constant dense<0.000000e+00> : vector<8x16xf32>
    %43 = tpu.matmul %26, %42, %cst_29 {dimension_numbers = #tpu.dot_dimension_numbers<[1], [0], [0], [1], [0, 0, 1, 1], [], []>} : vector<8x32xbf16>, vector<32x16xbf16>, vector<8x16xf32> -> vector<8x16xf32>
    %44 = arith.truncf %43 : vector<8x16xf32> to vector<8x16xbf16>
    %c0_30 = arith.constant 0 : index
    %c0_31 = arith.constant 0 : index
    %c0_32 = arith.constant 0 : index
    %c0_33 = arith.constant 0 : index
    %45 = vector.load %arg10[%c0_30, %c0_31, %c0_32, %c0_33] : memref<1x2x8x16xbf16, #tpu.memory_space<vmem>>, vector<1x1x8x16xbf16>
    %46 = vector.shape_cast %45 : vector<1x1x8x16xbf16> to vector<8x16xbf16>
    %47 = vector.shape_cast %44 : vector<8x16xbf16> to vector<1x1x8x16xbf16>
    tpu.vector_store %arg10[%c0_30, %c0_31, %c0_32, %c0_33], %47 {strides = array<i32>} : memref<1x2x8x16xbf16, #tpu.memory_space<vmem>>, vector<1x1x8x16xbf16>,
    %c1 = arith.constant 1 : index
    %c0_34 = arith.constant 0 : index
    %c0_35 = arith.constant 0 : index
    %48 = vector.load %arg5[%c1, %c0_34, %c0_35] : memref<2x32x16xbf16, #tpu.memory_space<vmem>>, vector<1x32x16xbf16>
    %49 = vector.shape_cast %48 : vector<1x32x16xbf16> to vector<32x16xbf16>
    %cst_36 = arith.constant dense<0.000000e+00> : vector<8x16xf32>
    %50 = tpu.matmul %26, %49, %cst_36 {dimension_numbers = #tpu.dot_dimension_numbers<[1], [0], [0], [1], [0, 0, 1, 1], [], []>} : vector<8x32xbf16>, vector<32x16xbf16>, vector<8x16xf32> -> vector<8x16xf32>
    %51 = arith.truncf %50 : vector<8x16xf32> to vector<8x16xbf16>
    %c0_37 = arith.constant 0 : index
    %c1_38 = arith.constant 1 : index
    %c0_39 = arith.constant 0 : index
    %c0_40 = arith.constant 0 : index
    %52 = vector.load %arg8[%c0_37, %c1_38, %c0_39, %c0_40] : memref<1x2x8x16xbf16, #tpu.memory_space<vmem>>, vector<1x1x8x16xbf16>
    %53 = vector.shape_cast %52 : vector<1x1x8x16xbf16> to vector<8x16xbf16>
    %54 = vector.shape_cast %51 : vector<8x16xbf16> to vector<1x1x8x16xbf16>
    tpu.vector_store %arg8[%c0_37, %c1_38, %c0_39, %c0_40], %54 {strides = array<i32>} : memref<1x2x8x16xbf16, #tpu.memory_space<vmem>>, vector<1x1x8x16xbf16>,
    %c1_41 = arith.constant 1 : index
    %c0_42 = arith.constant 0 : index
    %c0_43 = arith.constant 0 : index
    %55 = vector.load %arg6[%c1_41, %c0_42, %c0_43] : memref<2x32x16xbf16, #tpu.memory_space<vmem>>, vector<1x32x16xbf16>
    %56 = vector.shape_cast %55 : vector<1x32x16xbf16> to vector<32x16xbf16>
    %cst_44 = arith.constant dense<0.000000e+00> : vector<8x16xf32>
    %57 = tpu.matmul %26, %56, %cst_44 {dimension_numbers = #tpu.dot_dimension_numbers<[1], [0], [0], [1], [0, 0, 1, 1], [], []>} : vector<8x32xbf16>, vector<32x16xbf16>, vector<8x16xf32> -> vector<8x16xf32>
    %58 = arith.truncf %57 : vector<8x16xf32> to vector<8x16xbf16>
    %c0_45 = arith.constant 0 : index
    %c1_46 = arith.constant 1 : index
    %c0_47 = arith.constant 0 : index
    %c0_48 = arith.constant 0 : index
    %59 = vector.load %arg9[%c0_45, %c1_46, %c0_47, %c0_48] : memref<1x2x8x16xbf16, #tpu.memory_space<vmem>>, vector<1x1x8x16xbf16>
    %60 = vector.shape_cast %59 : vector<1x1x8x16xbf16> to vector<8x16xbf16>
    %61 = vector.shape_cast %58 : vector<8x16xbf16> to vector<1x1x8x16xbf16>
    tpu.vector_store %arg9[%c0_45, %c1_46, %c0_47, %c0_48], %61 {strides = array<i32>} : memref<1x2x8x16xbf16, #tpu.memory_space<vmem>>, vector<1x1x8x16xbf16>,
    %c1_49 = arith.constant 1 : index
    %c0_50 = arith.constant 0 : index
    %c0_51 = arith.constant 0 : index
    %62 = vector.load %arg7[%c1_49, %c0_50, %c0_51] : memref<2x32x16xbf16, #tpu.memory_space<vmem>>, vector<1x32x16xbf16>
    %63 = vector.shape_cast %62 : vector<1x32x16xbf16> to vector<32x16xbf16>
    %cst_52 = arith.constant dense<0.000000e+00> : vector<8x16xf32>
    %64 = tpu.matmul %26, %63, %cst_52 {dimension_numbers = #tpu.dot_dimension_numbers<[1], [0], [0], [1], [0, 0, 1, 1], [], []>} : vector<8x32xbf16>, vector<32x16xbf16>, vector<8x16xf32> -> vector<8x16xf32>
    %65 = arith.truncf %64 : vector<8x16xf32> to vector<8x16xbf16>
    %c0_53 = arith.constant 0 : index
    %c1_54 = arith.constant 1 : index
    %c0_55 = arith.constant 0 : index
    %c0_56 = arith.constant 0 : index
    %66 = vector.load %arg10[%c0_53, %c1_54, %c0_55, %c0_56] : memref<1x2x8x16xbf16, #tpu.memory_space<vmem>>, vector<1x1x8x16xbf16>
    %67 = vector.shape_cast %66 : vector<1x1x8x16xbf16> to vector<8x16xbf16>
    %68 = vector.shape_cast %65 : vector<8x16xbf16> to vector<1x1x8x16xbf16>
    tpu.vector_store %arg10[%c0_53, %c1_54, %c0_55, %c0_56], %68 {strides = array<i32>} : memref<1x2x8x16xbf16, #tpu.memory_space<vmem>>, vector<1x1x8x16xbf16>,
    return
  }
  func.func @transform_0(%arg0: i32, %arg1: i32) -> (i32, i32, i32) {
    %c0_i32 = arith.constant 0 : i32
    %c0_i32_0 = arith.constant 0 : i32
    return %arg0, %arg1, %c0_i32 : i32, i32, i32
  }
  func.func @transform_1(%arg0: i32, %arg1: i32) -> (i32, i32) {
    %c0_i32 = arith.constant 0 : i32
    %c0_i32_0 = arith.constant 0 : i32
    %c0_i32_1 = arith.constant 0 : i32
    return %c0_i32, %c0_i32_0 : i32, i32
  }
  func.func @transform_2(%arg0: i32, %arg1: i32) -> (i32, i32) {
    %c0_i32 = arith.constant 0 : i32
    %c0_i32_0 = arith.constant 0 : i32
    %c0_i32_1 = arith.constant 0 : i32
    return %c0_i32, %c0_i32_0 : i32, i32
  }
  func.func @transform_3(%arg0: i32, %arg1: i32) -> (i32, i32, i32) {
    %c0_i32 = arith.constant 0 : i32
    %c0_i32_0 = arith.constant 0 : i32
    %c0_i32_1 = arith.constant 0 : i32
    %c0_i32_2 = arith.constant 0 : i32
    return %c0_i32, %c0_i32_0, %c0_i32_1 : i32, i32, i32
  }
  func.func @transform_4(%arg0: i32, %arg1: i32) -> (i32, i32, i32) {
    %c0_i32 = arith.constant 0 : i32
    %c0_i32_0 = arith.constant 0 : i32
    %c0_i32_1 = arith.constant 0 : i32
    %c0_i32_2 = arith.constant 0 : i32
    return %c0_i32, %c0_i32_0, %c0_i32_1 : i32, i32, i32
  }
  func.func @transform_5(%arg0: i32, %arg1: i32) -> (i32, i32, i32) {
    %c0_i32 = arith.constant 0 : i32
    %c0_i32_0 = arith.constant 0 : i32
    %c0_i32_1 = arith.constant 0 : i32
    %c0_i32_2 = arith.constant 0 : i32
    return %c0_i32, %c0_i32_0, %c0_i32_1 : i32, i32, i32
  }
  func.func @transform_6(%arg0: i32, %arg1: i32) -> (i32, i32, i32, i32) {
    %c0_i32 = arith.constant 0 : i32
    %c0_i32_0 = arith.constant 0 : i32
    %c0_i32_1 = arith.constant 0 : i32
    return %arg0, %c0_i32, %arg1, %c0_i32_0 : i32, i32, i32, i32
  }
  func.func @transform_7(%arg0: i32, %arg1: i32) -> (i32, i32, i32, i32) {
    %c0_i32 = arith.constant 0 : i32
    %c0_i32_0 = arith.constant 0 : i32
    %c0_i32_1 = arith.constant 0 : i32
    return %arg0, %c0_i32, %arg1, %c0_i32_0 : i32, i32, i32, i32
  }
  func.func @transform_8(%arg0: i32, %arg1: i32) -> (i32, i32, i32, i32) {
    %c0_i32 = arith.constant 0 : i32
    %c0_i32_0 = arith.constant 0 : i32
    %c0_i32_1 = arith.constant 0 : i32
    return %arg0, %c0_i32, %arg1, %c0_i32_0 : i32, i32, i32, i32
  }
}

</mosaic_0001>

<bundles_post_ra>
// kernel: tpu_custom_call.1
= control target key start
LH: loop header
LB: loop body
LE: loop exit
PB: predicated region body
PF: predicated region fallthrough
CT: control target
= control target key end

     0   :  { %s1395_s0 = inlined_call_operand.vmem [shape: f32[2,8,32], index: 0, kind: input, shape index: {}]   ;;  %s1396_s1 = inlined_call_operand.vmem [shape: f32[1,32], index: 1, kind: input, shape index: {}]   ;;  %s1397_s2 = inlined_call_operand.vmem [shape: f32[1,32], index: 2, kind: input, shape index: {}]   ;;  %s1398_s3 = inlined_call_operand.vmem [shape: bf16[2,32,16], index: 3, kind: input, shape index: {}]   ;;  %s1399_s4 = inlined_call_operand.vmem [shape: bf16[2,32,16], index: 4, kind: input, shape index: {}]   ;;  %s1400_s5 = inlined_call_operand.vmem [shape: bf16[2,32,16], index: 5, kind: input, shape index: {}]   ;;  %s1401_s6 = inlined_call_operand.hbm [shape: bf16[2,2,8,16], index: 6, kind: output, shape index: {0}]   ;;  %s1402_s7 = inlined_call_operand.hbm [shape: bf16[2,2,8,16], index: 7, kind: output, shape index: {1}]   ;;  %s1403_s8 = inlined_call_operand.hbm [shape: bf16[2,2,8,16], index: 8, kind: output, shape index: {2}]  }
   0x1   :  { %1406 = sst [smem:[#allocation9_spill]] %s1395_s0 }
   0x2   :  { %1407 = sst [smem:[#allocation10_spill]] %s1396_s1 }
   0x3   :  { %1408 = sst [smem:[#allocation11_spill]] %s1397_s2 }
   0x4   :  { %1409 = sst [smem:[#allocation12_spill]] %s1398_s3 }
   0x5   :  { %1410 = sst [smem:[#allocation13_spill]] %s1399_s4 }
   0x6   :  { %14 = vsyncpa [#allocation3], 0 }
   0x7   :  { %16 = vsyncpa [#allocation3 + $0x1], 0 }
   0x8   :  { %17 = vsyncpa [#allocation5], 0 }
   0x9   :  { %19 = vsyncpa [#allocation5 + $0x1], 0  ;;  %s1158_s27 = smov 0   ;;  %s1160_s28 = smov 0  }
   0xa   :  { %s1162_s29 = smov 0   ;;  %s1164_s30 = smov 0  }
   0xb   :  { %s1166_s9 = smov 0   ;;  %s1168_s10 = smov 0  }
   0xc LB: > { %s1405_s11 = sadd.s32 4294967295, %s1108_s10   ;;  %s1404_s12 = sadd.s32 4294967294, %s1108_s10   ;;  %s1108_s10 = sphi %s1168_s10, %s25_s10   ;;  %s1104_s9 = sphi %s1166_s9, %s1424_s9   ;;  %s1100_s30 = sphi %s1164_s30, %s1423_s30   ;;  %s1096_s29 = sphi %s1162_s29, %s1422_s29   ;;  %s1092_s28 = sphi %s1160_s28, %s1421_s28   ;;  %s1088_s27 = sphi %s1158_s27, %s1420_s27  }
   0xd   : > { %s37_s13 = sadd.s32 1, %s1104_s9  ;;  %s179_s14 = sadd.s32 1, %s1096_s29 }
   0xe   : > { %p39_p0 = scmp.ge.s32.totalorder %s37_s13, 2  ;;  %p189_p1 = scmp.ne.s32.totalorder %s1096_s29, %s1092_s28 }
   0xf   : > { %p190_p2 = scmp.eq.s32.totalorder %s1405_s11, 1  ;;  %p195_p3 = scmp.ne.s32.totalorder %s1092_s28, %s1088_s27 }
  0x10   : > { %s1426_s13 = smov (%p39_p0, %s37_s13), 0  ;;  %p196_p5 = scmp.eq.s32.totalorder %s1404_s12, 1 }
  0x11   : > { %p1200_p4 = por %p190_p2, %p189_p1  ;;  %s174_s16 = ssub.s32 %s1104_s9, %s1426_s13 }
  0x12   : > { %p796_p6 = scmp.ge.s32.totalorder %s1108_s10, 1  ;;  %p177_p7 = scmp.eq.s32.totalorder %s174_s16, 0 }
  0x13   : > { %p1209_p8 = por %p196_p5, %p195_p3  ;;  %p295_p9 = scmp.lt.s32.totalorder %s1108_s10, 3 }
  0x14   : > { %s1215_s18 = scalar_select %p177_p7, %s1096_s29, %s179_s14  }
  0x15   : > { %p296_p10 = pnand %p796_p6, %p295_p9 }
  0x16   : > { %p341_p11 = scmp.lt.s32.totalorder (!%p296_p10), %s1100_s30, 1  ;;  %s1413_s0 = sld [smem:[#allocation9_spill]] (!%p296_p10) }
  0x17   : > { %299 = sbr.rel (%p296_p10) target bundleno = 471 (0x1d7), region = 44  ;;  %s1414_s3 = sld [smem:[#allocation12_spill]] (!%p296_p10) }
  0x18   : > { %s1415_s4 = sld [smem:[#allocation13_spill]] (!%p296_p10)  ;;  %s324_s22 = sand.u32 (!%p296_p10), 1, %s1092_s28  }
  0x19   : > { %s1416_s1 = sld [smem:[#allocation10_spill]] (!%p296_p10)  ;;  %s1274_s24 = sshll.u32 (!%p296_p10), %s1100_s30, 3 }
  0x1a   : > { %s1417_s2 = sld [smem:[#allocation11_spill]] (!%p296_p10)  ;;  %s610_s16 = scalar_lea.hbm (!%p296_p10), %s1401_s6, %s1274_s24 }
  0x1b   : > { %s1285_s21 = sshll.u32 (!%p296_p10), %s610_s16, 4  ;;  %s628_s16 = scalar_lea.hbm (!%p296_p10), %s1402_s7, %s1274_s24  ;;  %s614_s21 = int_to_ptr.hbm [resolvable:$true] %s1285_s21 }
  0x1c   : > { %s342_s19 = scalar_select %p341_p11, %s1100_s30, 1  ;;  %vm352_vm0 = vcmask 261120   ;;  %v1110_v2 = vmov 32.0   ;;  %v886_v16 = vld [vmem:[%s1400_s5 + $0x8] sm:$0xff]  ;;  %v885_v20 = vld [vmem:[%s1400_s5] sm:$0xff]  ;;  %v892_v24 = vld [vmem:[%s1400_s5 + $0x18] sm:$0xff] }
  0x1d   : > { %966 = vrcp.f32 %v1110_v2  ;;  %v882_v14 = vld [vmem:[%s1414_s3 + $0x8] sm:$0xff]  ;;  %v888_v17 = vld [vmem:[%s1414_s3 + $0x18] sm:$0xff]  ;;  %479 = vmatpush.bf16.msra.mxu2 %v886_v16  ;;  %v881_v18 = vld [vmem:[%s1414_s3] sm:$0xff]  ;;  %vm424_vm5 = vcmask 125952   ;;  %s588_s12 = scalar_lea.sflag [#allocation3], %s324_s22  ;;  %s984_s11 = sshra.s32 %s614_s21, 4  ;;  %s985_s11 = int_to_ptr.hbm [resolvable:$true] %s984_s11 }
  0x1e   : > { %s800_s20 = sshll.u32 %s342_s19, 3  ;;  %v884_v15 = vld [vmem:[%s1415_s4 + $0x8] sm:$0xff]  ;;  %416 = vmatpush.bf16.msra.mxu0 %v882_v14  ;;  %511 = vmatpush.bf16.msra.mxu3 %v888_v17  ;;  %v883_v19 = vld [vmem:[%s1415_s4] sm:$0xff]  ;;  %v887_v21 = vld [vmem:[%s1414_s3 + $0x10] sm:$0xff]  ;;  %p991_p1 = scmp.lt.s32.totalorder %s985_s11, %s1401_s6 }
  0x1f   : > { %s347_s23 = scalar_lea.vmem %s1413_s0, %s800_s20  ;;  %448 = vmatpush.bf16.msra.mxu1 %v884_v15  ;;  %v890_v23 = vld [vmem:[%s1415_s4 + $0x18] sm:$0xff]  ;;  %v889_v26 = vld [vmem:[%s1415_s4 + $0x10] sm:$0xff]  ;;  %v964_v35 = vld [vmem:[%s1416_s1] ss:$0 sm:$0xff]  ;;  %s986_s0 = scalar_lea.hbm %s985_s11, 8 }
  0x20   : > { %v349_v0 = vld [vmem:[%s347_s23] sm:$0xff]  ;;  %v891_v27 = vld [vmem:[%s1400_s5 + $0x10] sm:$0xff]  ;;  %s797_s23 = sshll.u32 %s324_s22, 3  ;;  %p987_p12 = scmp.ne.s32.totalorder %s985_s11, %s986_s0 }
  0x21   : > { %v353_v1 = vsel %vm352_vm0, %v349_v0, 0.0  ;;  %480 = vmatpush.bf16.msra.mxu2 %v885_v20  ;;  %v965_v37 = vld [vmem:[%s1417_s2] ss:$0 sm:$0xff]  ;;  %s326_s25 = scalar_lea.vmem [#allocation2], %s797_s23  ;;  %s1281_s19 = scalar_lea.vmem [#allocation4], %s797_s23 }
  0x22   : > { %354 = vadd.xlane.f32.xlu0 %v353_v1  ;;  %417 = vmatpush.bf16.msra.mxu0 %v881_v18  ;;  %s611_s20 = sshll.u32 %s326_s25, 4  ;;  %s1290_s30 = scalar_lea.vmem [#allocation6], %s797_s23  ;;  %s1287_s20 = int_to_ptr.vmem [resolvable:$true] %s611_s20 }
  0x23   : > { %v967_v3 = vpop.eup %966  ;;  %449 = vmatpush.bf16.msra.mxu1 %v883_v19  ;;  %512 = vmatpush.bf16.msra.mxu3 %v887_v21  ;;  %p988_p13 = pnand %p987_p12, %p1200_p4  ;;  %s990_s2 = scalar_lea.hbm %s1401_s6, 16 }
  0x24   : > { %v357_v4 = vmul.f32 32.0, %v967_v3  ;;  %vm361_vm1 = vweird.f32 %v967_v3  ;;  %p992_p2 = scmp.lt.s32.totalorder %s990_s2, %s986_s0 }
  0x25   : > { %p989_p0 = pneg %p988_p13 }
  0x26   : > { %v358_v5 = vsub.f32 1.0, %v357_v4  ;;  %544 = vmatpush.bf16.msrb.mxu0 %v890_v23  ;;  %p993_p3 = por %p992_p2, %p991_p1 }
  0x27   : > { %577 = vmatpush.bf16.msrb.mxu1 %v892_v24 }
  0x28   : > { %v359_v6 = vmul.f32 %v967_v3, %v358_v5  ;;  %p994_p5 = pnand %p993_p3, %p989_p0 }
  0x2a   : > { %v360_v7 = vadd.f32 %v967_v3, %v359_v6  ;;  %545 = vmatpush.bf16.msrb.mxu0 %v889_v26 }
  0x2b   : > { %578 = vmatpush.bf16.msrb.mxu1 %v891_v27 }
  0x2c   : > { %v362_v8 = vsel %vm361_vm1, %v967_v3, %v360_v7 }
  0x95   : > { %v355_v9 = vpop.xlane.xlu0 %354 }
  0x96   : > { %v363_v10 = vmul.f32 %v362_v8, %v355_v9 }
  0x98   : > { %v364_v11 = vsub.f32 %v349_v0, %v363_v10 }
  0x9a   : > { %v365_v12 = vmul.f32 %v364_v11, %v364_v11 }
  0x9c   : > { %v366_v13 = vsel %vm352_vm0, %v365_v12, 0.0 }
  0x9d   : > { %367 = vadd.xlane.f32.xlu0 %v366_v13 }
 0x110   : > { %v368_v22 = vpop.xlane.xlu0 %367 }
 0x111   : > { %v369_v25 = vmul.f32 %v368_v22, %v362_v8 }
 0x113   : > { %v370_v28 = vadd.f32 1e-05, %v369_v25 }
 0x115   : > { %968 = vrsqrt.f32 %v370_v28  ;;  %vm377_vm3 = vweird.f32 %v370_v28 }
 0x11b   : > { %v969_v29 = vpop.eup %968 }
 0x11c   : > { %v372_v30 = vmul.f32 %v969_v29, %v370_v28  ;;  %vm378_vm2 = vweird.f32 %v969_v29 }
 0x11d   : > { %vm379_vm4 = vmor %vm377_vm3, %vm378_vm2 }
 0x11e   : > { %v373_v31 = vmul.f32 %v969_v29, %v372_v30 }
 0x120   : > { %v374_v32 = vmul.f32 0.5, %v373_v31 }
 0x122   : > { %v375_v33 = vsub.f32 1.5, %v374_v32 }
 0x124   : > { %v376_v34 = vmul.f32 %v969_v29, %v375_v33 }
 0x126   : > { %v380_v36 = vsel %vm379_vm4, %v969_v29, %v376_v34 }
 0x127   : > { %v381_v38 = vmul.f32 %v380_v36, %v364_v11 }
 0x129   : > { %v385_v39 = vmul.f32 %v964_v35, %v381_v38 }
 0x12b   : > { %v389_v40 = vadd.f32 %v965_v37, %v385_v39 }
 0x12d   : > { %v390_v41 = vpack.c.bf16 %v389_v40, %v389_v40 }
 0x12f   : > { %809 = vmatmul.msk.bf16.vlgmr.msra.gmra.mxu0 %vm352_vm0, %v390_v41  ;;  %818 = vmatmul.msk.bf16.vlgmr.msra.gmra.mxu1 %vm352_vm0, %v390_v41 }
 0x130   : > { %827 = vmatmul.msk.bf16.vlgmr.msra.gmra.mxu2 %vm352_vm0, %v390_v41  ;;  %840 = vmatmul.msk.bf16.vlgmr.msra.gmra.mxu3 %vm352_vm0, %v390_v41 }
 0x13f   : > { %854 = vmatmul.msk.bf16.vlgmr.msrb.gmra.mxu0 %vm352_vm0, %v390_v41  ;;  %868 = vmatmul.msk.bf16.vlgmr.msrb.gmra.mxu1 %vm352_vm0, %v390_v41 }
 0x1ac   : > { %v419_v42 = vpop.f32.mrf.mxu0  ;;  %v451_v43 = vpop.f32.mrf.mxu1 }
 0x1ad   : > { %v423_v44 = vpack.c.bf16 %v419_v42, %v419_v42  ;;  %v455_v45 = vpack.c.bf16 %v451_v43, %v451_v43 }
 0x1af   : > { %425 = vst.msk [vmem:[%s326_s25] sm:$0xf] %vm424_vm5, %v423_v44 }
 0x1b0   : > { %456 = vst.msk [vmem:[%s1281_s19] sm:$0xf] %vm424_vm5, %v455_v45 }
 0x1b3   : > { %v482_v46 = vpop.f32.mrf.mxu2  ;;  %v514_v47 = vpop.f32.mrf.mxu3 }
 0x1b4   : > { %v486_v48 = vpack.c.bf16 %v482_v46, %v482_v46  ;;  %v518_v49 = vpack.c.bf16 %v514_v47, %v514_v47  ;;  %v421_v50 = vpop.f32.mrf.mxu0  ;;  %v453_v51 = vpop.f32.mrf.mxu1 }
 0x1b6   : > { %487 = vst.msk [vmem:[%s1290_s30] sm:$0xf] %vm424_vm5, %v486_v48 }
 0x1b7   : > { %841 = vst.msk [vmem:[%s326_s25 + $0x4] sm:$0xf] %vm424_vm5, %v518_v49 }
 0x1b8   : > { %997 = shalt.err (!%p994_p5)
}
 0x1b9   : > { %s1111_s22 = smov 64   ;;  %s1112_s25 = smov 4  }
 0x1ba   : > { %896 = dma.vmem_to_hbm [thread:$0]  (%p1200_p4), %s1287_s20, 128, %s614_s21, %s588_s12, %s1111_s22, %s1111_s22, %s1112_s25  }
 0x1bb   : > { %s646_s0 = scalar_lea.hbm %s1403_s8, %s1274_s24  ;;  %s629_s2 = sshll.u32 %s1281_s19, 4  ;;  %v484_v52 = vpop.f32.mrf.mxu2  ;;  %v516_v53 = vpop.f32.mrf.mxu3  ;;  %s630_s2 = int_to_ptr.vmem [resolvable:$true] %s629_s2 }
 0x1bc   : > { %s1418_s4 = sadd.s32 4294967295, %s1108_s10   ;;  %s1322_s26 = sshll.u32 %s628_s16, 4  ;;  %v547_v54 = vpop.f32.mrf.mxu0  ;;  %v580_v55 = vpop.f32.mrf.mxu1  ;;  %s632_s26 = int_to_ptr.hbm [resolvable:$true] %s1322_s26 }
 0x1bd   : > { %s1320_s11 = sand.u32 1, %s1418_s4   ;;  %s647_s14 = sshll.u32 %s1290_s30, 4  ;;  %v551_v56 = vpack.c.bf16 %v547_v54, %v547_v54  ;;  %v584_v57 = vpack.c.bf16 %v580_v55, %v580_v55  ;;  %s1328_s14 = int_to_ptr.vmem [resolvable:$true] %s647_s14 }
 0x1be   : > { %s1325_s12 = sshll.u32 %s646_s0, 4  ;;  %s593_s24 = scalar_lea.sflag [#allocation5], %s1320_s11  ;;  %s650_s12 = int_to_ptr.hbm [resolvable:$true] %s1325_s12 }
 0x1bf   : > { %855 = vst.msk [vmem:[%s1281_s19 + $0x4] sm:$0xf] %vm424_vm5, %v551_v56  ;;  %s1012_s20 = sshra.s32 %s632_s26, 4  ;;  %s1018_s1 = scalar_lea.hbm %s1402_s7, 16  ;;  %s1013_s20 = int_to_ptr.hbm [resolvable:$true] %s1012_s20 }
 0x1c0   : > { %869 = vst.msk [vmem:[%s1290_s30 + $0x4] sm:$0xf] %vm424_vm5, %v584_v57  ;;  %s1014_s21 = scalar_lea.hbm %s1013_s20, 8  ;;  %p1019_p10 = scmp.lt.s32.totalorder %s1013_s20, %s1402_s7 }
 0x1c1   : > { %p1015_p6 = scmp.ne.s32.totalorder %s1013_s20, %s1014_s21  ;;  %p1020_p11 = scmp.lt.s32.totalorder %s1018_s1, %s1014_s21 }
 0x1c3   : > { %p1016_p7 = pnand %p1015_p6, %p1200_p4  ;;  %p1021_p12 = por %p1020_p11, %p1019_p10 }
 0x1c5   : > { %p1017_p9 = pneg %p1016_p7 }
 0x1c7   : > { %p1022_p13 = pnand %p1021_p12, %p1017_p9 }
 0x1c9   : > { %1025 = shalt.err (!%p1022_p13)
}
 0x1ca   : > { %897 = dma.vmem_to_hbm [thread:$0]  (%p1200_p4), %s630_s2, 128, %s632_s26, %s593_s24, %s1111_s22, %s1111_s22, %s1112_s25  }
 0x1cb   : > { %s1040_s19 = sshra.s32 %s650_s12, 4  ;;  %s1046_s21 = scalar_lea.hbm %s1403_s8, 16  ;;  %s1041_s19 = int_to_ptr.hbm [resolvable:$true] %s1040_s19 }
 0x1cc   : > { %s1042_s30 = scalar_lea.hbm %s1041_s19, 8  ;;  %p1047_p3 = scmp.lt.s32.totalorder %s1041_s19, %s1403_s8 }
 0x1cd   : > { %p1043_p0 = scmp.ne.s32.totalorder %s1041_s19, %s1042_s30  ;;  %p1048_p5 = scmp.lt.s32.totalorder %s1046_s21, %s1042_s30 }
 0x1cf   : > { %p1044_p1 = pnand %p1043_p0, %p1200_p4  ;;  %p1049_p6 = por %p1048_p5, %p1047_p3 }
 0x1d1   : > { %p1045_p2 = pneg %p1044_p1 }
 0x1d3   : > { %p1050_p7 = pnand %p1049_p6, %p1045_p2 }
 0x1d5   : > { %1053 = shalt.err (!%p1050_p7)
}
 0x1d6   : > { %898 = dma.vmem_to_hbm [thread:$0]  (%p1200_p4), %s1328_s14, 128, %s650_s12, %s593_s24, %s1111_s22, %s1111_s22, %s1112_s25   ;;  %v549_v58 = vpop.f32.mrf.mxu0  ;;  %v582_v59 = vpop.f32.mrf.mxu1 }
 0x1d7 PF: > { %p912_p9 = scmp.ge.s32.totalorder %s1108_s10, 2  ;;  %s664_s2 = sand.u32 1, %s1088_s27  }
 0x1d8   : > { %s665_s15 = scalar_lea.sflag [#allocation3], %s664_s2 }
 0x1d9   : > { %p903_p10 = pnand %p912_p9, %p1209_p8 }
 0x1db   : > { %p904_p11 = pneg %p903_p10 }
 0x1dd   : > { %1079 = dma.done.wait (%p904_p11), %s665_s15, 128  }
 0x1de   : > { %1081 = vsyncadd (%p904_p11), %s665_s15, 4294967168  ;;  %s1419_s11 = sadd.s32 4294967294, %s1108_s10  }
 0x1df   : > { %s674_s26 = sand.u32 1, %s1419_s11  }
 0x1e0   : > { %s675_s1 = scalar_lea.sflag [#allocation5], %s674_s26 }
 0x1e1   : > { %1083 = dma.done.wait (%p904_p11), %s675_s1, 256  }
 0x1e2   : > { %1085 = vsyncadd (%p904_p11), %s675_s1, 4294967040  ;;  %s25_s10 = sadd.s32 1, %s1108_s10   ;;  %s1420_s27 = smov %s1092_s28 }
 0x1e3   : > { %p22_p4 = scmp.ge.s32.totalorder %s25_s10, 4   ;;  %s1421_s28 = smov %s1096_s29 }
 0x1e4   : > { %s1422_s29 = smov %s1215_s18  ;;  %s1423_s30 = smov %s1104_s9 }
 0x1e5   : > { %s1424_s9 = smov %s1426_s13  ;;  %24 = sbr.rel (!%p22_p4) target bundleno = 12 (0xc), region = 117 }
 0x1ea   :  { %691 = vsyncpa [#allocation3], 1 }
 0x1eb   :  { %693 = vsyncpa [#allocation3 + $0x1], 1 }
 0x1ec   :  { %694 = vsyncpa [#allocation5], 1 }
 0x1ed   :  { %696 = vsyncpa [#allocation5 + $0x1], 1 }

</bundles_post_ra>
